<compile_context>
chip_gen: v6e
topology: v6e:2x2x1
jax: 0.10.0
libtpu: 0.0.40
codegen_flags: <defaults>
</compile_context>

<pallas_src>
import functools

import jax
import jax.numpy as jnp
from jax.experimental import pallas as pl
from jax.experimental.pallas import tpu as pltpu


# ----------------------------------------------------------------------------
# Fused kernel: squeeze + excite + recalibrate for one batch tile.
# ----------------------------------------------------------------------------
def _se_block_kernel(x_ref, w1t_ref, b1_ref, w2_ref, b2_ref, o_ref, *, inv_hw):
    """x_ref : (BT, C, HW)  activations (native dtype)
    w1t_ref: (C, Cr)  fc1 weight, transposed (W1.T)
    b1_ref : (1, Cr)
    w2_ref : (C, Cr)  fc2 weight, PyTorch (out_features, in_features)
    b2_ref : (C, 1)
    o_ref  : (BT, C, HW)
    """
    # Squeeze: per-(batch, channel) spatial mean, f32 accumulation on the
    # lane axis (HW is lane-dense).
    sums = jnp.sum(x_ref[...].astype(jnp.float32), axis=-1, keepdims=True)  # (BT, C, 1)
    means = sums * jnp.float32(inv_hw)

    w1t = w1t_ref[...]  # (C, Cr)
    b1 = b1_ref[...]    # (1, Cr)
    w2 = w2_ref[...]    # (C, Cr)
    b2 = b2_ref[...]    # (C, 1)

    # Excite, vectorized over the batch tile (tiny VPU/XLU work; no unroll,
    # no concatenate).  fc1: h[b, j] = sum_c means[b, c] * W1[j, c] + b1[j]
    h = jnp.sum(means * w1t[None, :, :], axis=1, keepdims=True) + b1[None, :, :]  # (BT, 1, Cr)
    h = jnp.where(h > 0, h, jnp.float32(0.01) * h)  # LeakyReLU (PyTorch default 0.01)
    # fc2: e[b, c] = sum_j h[b, j] * W2[c, j] + b2[c]
    e = jnp.sum(h * w2[None, :, :], axis=-1, keepdims=True) + b2[None, :, :]      # (BT, C, 1)
    gate = jax.nn.sigmoid(e)                                                       # (BT, C, 1)

    # Recalibrate: re-read the tile from VMEM (keeps vreg live-range tiny) and
    # broadcast the per-(batch, channel) gate across the spatial lanes.
    o_ref[...] = (x_ref[...] * gate).astype(o_ref.dtype)


# ----------------------------------------------------------------------------
# Fallback scale kernel (spatially chunked) for very large C * H * W.
# ----------------------------------------------------------------------------
def _scale_kernel(x_ref, gate_ref, o_ref):
    # x_ref: (1, C, HWc), gate_ref: (1, C, 1)
    o_ref[...] = (x_ref[...] * gate_ref[...]).astype(o_ref.dtype)


def _gate_from_means(means, w1t, b1r, w2r, b2r):
    """means: (B, C) f32 -> gate (B, C) f32 (plain JAX; microscopic work)."""
    h = means @ w1t + b1r                  # (B, Cr)
    h = jnp.where(h > 0, h, 0.01 * h)      # LeakyReLU(0.01)
    e = h @ w2r.T + b2r.reshape(1, -1)     # (B, C)
    return jax.nn.sigmoid(e)


# ----------------------------------------------------------------------------
# VMEM budgeting / tile selection.
# ----------------------------------------------------------------------------
def _vmem_budgets():
    """Returns (per-tile budget bytes, vmem_limit_bytes for the compiler)."""
    cap = 64 * 1024 * 1024  # conservative default (v7x per-TensorCore VMEM)
    try:
        info = pltpu.get_tpu_info()
        queried = int(getattr(info, "vmem_capacity_bytes", cap))
        if queried > 0:
            cap = queried
    except Exception:
        pass
    cap = max(32 << 20, min(cap, 128 << 20))
    # Streamed footprint = 2x double-buffered input tile + 2x output tile.
    # Leave 16 MiB headroom for weights/intermediates; cap total at 96 MiB so
    # v5e/v6e get ~24 MiB tiles while v7x (64 MiB VMEM) stays near 48 MiB.
    total_budget = max(8 << 20, min(cap - (16 << 20), 96 << 20))
    tile_budget = total_budget // 4
    vmem_limit = min(cap, total_budget + (8 << 20))
    return tile_budget, vmem_limit


def _choose_batches_per_block(B, C, HW, tile_budget_bytes):
    """Whole batches per grid block, or None if one batch doesn't fit.

    Accounts for (8, 128) VMEM layout padding.  Prefers the largest divisor of
    B that fits the tile budget while keeping >= 2 grid steps (so the
    'parallel' axis can split across v7x's two TensorCores)."""
    c_pad = -(-C // 8) * 8
    hw_pad = -(-HW // 128) * 128
    bytes_per_batch = c_pad * hw_pad * 4  # conservative (f32 layout) estimate
    if bytes_per_batch > tile_budget_bytes:
        return None
    best = 1
    for bt in range(1, B + 1):
        if B % bt:
            continue
        if bt * bytes_per_batch > tile_budget_bytes:
            break
        if B == 1 or (B // bt) >= 2:
            best = bt
    return best


# ----------------------------------------------------------------------------
# Wrappers.
# ----------------------------------------------------------------------------
def _se_block_chunked(x3, w1t, b1r, w2r, b2r, tile_budget, vmem_limit):
    """Fallback when a single batch's (C, HW) slab exceeds the VMEM budget."""
    B, C, HW = x3.shape
    c_pad = -(-C // 8) * 8
    hw_pad = -(-HW // 128) * 128
    hw_chunk = (tile_budget // (c_pad * 4)) // 128 * 128
    hw_chunk = max(min(hw_chunk, hw_pad), 128)

    means = jnp.mean(x3.astype(jnp.float32), axis=-1)        # (B, C) -- XLA reduce
    gate = _gate_from_means(means, w1t, b1r, w2r, b2r)       # (B, C)

    if c_pad * hw_chunk * 4 > tile_budget:
        # TODO(synk): channel-chunked Pallas path for extreme C; XLA for now.
        return (x3.astype(jnp.float32) * gate[:, :, None]).astype(x3.dtype)

    gate3 = gate.reshape(B, C, 1)
    n_chunks = -(-HW // hw_chunk)
    return pl.pallas_call(
        _scale_kernel,
        out_shape=jax.ShapeDtypeStruct((B, C, HW), x3.dtype),
        grid=(B, n_chunks),
        in_specs=[
            pl.BlockSpec((1, C, hw_chunk), lambda b, j: (b, 0, j)),
            pl.BlockSpec((1, C, 1), lambda b, j: (b, 0, 0)),
        ],
        out_specs=pl.BlockSpec((1, C, hw_chunk), lambda b, j: (b, 0, j)),
        compiler_params=pltpu.CompilerParams(
            dimension_semantics=("parallel", "parallel"),
            vmem_limit_bytes=int(vmem_limit)),
    )(x3, gate3)


def se_block(x, w1, b1, w2, b2):
    """x: (B, C, H, W).  w1: (C//2, C), b1: (C//2,), w2: (C, C//2), b2: (C,)
    -- PyTorch nn.Linear parameter shapes (out_features, in_features)."""
    B, C, H, W = x.shape
    Cr = w1.shape[0]
    HW = H * W

    # Native-dtype, copy-free reshape: spatial axis rides the 128-wide lanes.
    x3 = x.reshape(B, C, HW)
    w1t = jnp.asarray(w1, jnp.float32).T          # (C, Cr)
    b1r = jnp.asarray(b1, jnp.float32).reshape(1, Cr)
    w2r = jnp.asarray(w2, jnp.float32)            # (C, Cr)
    b2r = jnp.asarray(b2, jnp.float32).reshape(C, 1)

    tile_budget, vmem_limit = _vmem_budgets()
    BT = _choose_batches_per_block(B, C, HW, tile_budget)

    if BT is None:
        out3 = _se_block_chunked(x3, w1t, b1r, w2r, b2r, tile_budget, vmem_limit)
        return out3.reshape(B, C, H, W)

    kernel = functools.partial(_se_block_kernel, inv_hw=1.0 / HW)
    out3 = pl.pallas_call(
        kernel,
        out_shape=jax.ShapeDtypeStruct((B, C, HW), x.dtype),
        grid=(B // BT,),
        in_specs=[
            # Streamed activation tile (double-buffered across grid steps).
            # Last two dims equal the full array dims -> always (8,128)-legal.
            pl.BlockSpec((BT, C, HW), lambda i: (i, 0, 0)),
            # Tiny FC parameters: constant block index -> fetched once and
            # kept VMEM-resident across grid steps.
            pl.BlockSpec((C, Cr), lambda i: (0, 0)),
            pl.BlockSpec((1, Cr), lambda i: (0, 0)),
            pl.BlockSpec((C, Cr), lambda i: (0, 0)),
            pl.BlockSpec((C, 1), lambda i: (0, 0)),
        ],
        out_specs=pl.BlockSpec((BT, C, HW), lambda i: (i, 0, 0)),
        compiler_params=pltpu.CompilerParams(
            dimension_semantics=("parallel",),
            vmem_limit_bytes=int(vmem_limit)),
    )(x3, w1t, b1r, w2r, b2r)

    return out3.reshape(B, C, H, W)


def se_block_reference(x, w1, b1, w2, b2):
    """Pure-JAX reference replicating the PyTorch forward."""
    x_avg = jnp.mean(x, axis=(2, 3))                       # (B, C)
    h = x_avg @ w1.T + b1
    h = jnp.where(h > 0, h, 0.01 * h)                      # LeakyReLU(0.01)
    e = jax.nn.sigmoid(h @ w2.T + b2)                      # (B, C)
    return x * e[:, :, None, None]


if __name__ == "__main__":
    B, C, H, W = 2, 4, 16, 16
    Cr = C // 2   # reduction_factor = 2

    key = jax.random.PRNGKey(0)
    kx, kw1, kb1, kw2, kb2 = jax.random.split(key, 5)

    x = jax.random.normal(kx, (B, C, H, W), dtype=jnp.float32)
    # Deterministic synthetic parameters with PyTorch nn.Linear shapes.
    w1 = jax.random.normal(kw1, (Cr, C), dtype=jnp.float32) * 0.5   # fc1 weight
    b1 = jax.random.normal(kb1, (Cr,), dtype=jnp.float32) * 0.1     # fc1 bias
    w2 = jax.random.normal(kw2, (C, Cr), dtype=jnp.float32) * 0.5   # fc2 weight
    b2 = jax.random.normal(kb2, (C,), dtype=jnp.float32) * 0.1      # fc2 bias

    out = se_block(x, w1, b1, w2, b2)
    out = jax.block_until_ready(out)

    ref = se_block_reference(x, w1, b1, w2, b2)
    assert out.shape == (B, C, H, W)
    assert jnp.allclose(out, ref, atol=1e-5, rtol=1e-5), "mismatch vs reference"

    print("KERNEL_OK")
</pallas_src>

<mosaic_0001>
module attributes {stable_mosaic.version = 11 : i64} {
  func.func @_se_block_kernel(%arg0: i32, %arg1: memref<1x4x256xf32, #tpu.memory_space<vmem>>, %arg2: memref<4x2xf32, #tpu.memory_space<vmem>>, %arg3: memref<1x2xf32, #tpu.memory_space<vmem>>, %arg4: memref<4x2xf32, #tpu.memory_space<vmem>>, %arg5: memref<4x1xf32, #tpu.memory_space<vmem>>, %arg6: memref<1x4x256xf32, #tpu.memory_space<vmem>>) attributes {dimension_semantics = [#tpu.dimension_semantics<parallel>], iteration_bounds = array<i64: 2>, scalar_prefetch = 0 : i64, scratch_operands = 0 : i64, tpu.core_type = #tpu.core_type<tc>, window_params = [{transform_indices = @transform_0, window_bounds = array<i64: 1, 4, 256>}, {pipeline_mode = #tpu.pipeline_mode<synchronous>, transform_indices = @transform_1, window_bounds = array<i64: 4, 2>}, {pipeline_mode = #tpu.pipeline_mode<synchronous>, transform_indices = @transform_2, window_bounds = array<i64: 1, 2>}, {pipeline_mode = #tpu.pipeline_mode<synchronous>, transform_indices = @transform_3, window_bounds = array<i64: 4, 2>}, {pipeline_mode = #tpu.pipeline_mode<synchronous>, transform_indices = @transform_4, window_bounds = array<i64: 4, 1>}, {transform_indices = @transform_5, window_bounds = array<i64: 1, 4, 256>}]} {
    %c0 = arith.constant 0 : index
    %c0_0 = arith.constant 0 : index
    %c0_1 = arith.constant 0 : index
    %0 = vector.load %arg1[%c0, %c0_0, %c0_1] : memref<1x4x256xf32, #tpu.memory_space<vmem>>, vector<1x4x256xf32>
    %cst = arith.constant dense<0.000000e+00> : vector<1x4xf32>
    %1 = vector.multi_reduction <add>, %0, %cst [2] : vector<1x4x256xf32> to vector<1x4xf32>
    %2 = vector.shape_cast %1 : vector<1x4xf32> to vector<1x4x1xf32>
    %cst_2 = arith.constant 3.906250e-03 : f32
    %3 = vector.broadcast %cst_2 : f32 to vector<1x4x1xf32>
    %4 = arith.mulf %2, %3 : vector<1x4x1xf32>
    %c0_3 = arith.constant 0 : index
    %c0_4 = arith.constant 0 : index
    %5 = vector.load %arg2[%c0_3, %c0_4] : memref<4x2xf32, #tpu.memory_space<vmem>>, vector<4x2xf32>
    %c0_5 = arith.constant 0 : index
    %c0_6 = arith.constant 0 : index
    %6 = vector.load %arg3[%c0_5, %c0_6] : memref<1x2xf32, #tpu.memory_space<vmem>>, vector<1x2xf32>
    %c0_7 = arith.constant 0 : index
    %c0_8 = arith.constant 0 : index
    %7 = vector.load %arg4[%c0_7, %c0_8] : memref<4x2xf32, #tpu.memory_space<vmem>>, vector<4x2xf32>
    %c0_9 = arith.constant 0 : index
    %c0_10 = arith.constant 0 : index
    %8 = vector.load %arg5[%c0_9, %c0_10] : memref<4x1xf32, #tpu.memory_space<vmem>>, vector<4x1xf32>
    %9 = vector.shape_cast %5 : vector<4x2xf32> to vector<1x4x2xf32>
    %10 = vector.broadcast %4 : vector<1x4x1xf32> to vector<1x4x2xf32>
    %11 = arith.mulf %10, %9 : vector<1x4x2xf32>
    %cst_11 = arith.constant dense<0.000000e+00> : vector<1x2xf32>
    %12 = vector.multi_reduction <add>, %11, %cst_11 [1] : vector<1x4x2xf32> to vector<1x2xf32>
    %13 = vector.shape_cast %12 : vector<1x2xf32> to vector<1x1x2xf32>
    %14 = vector.shape_cast %6 : vector<1x2xf32> to vector<1x1x2xf32>
    %15 = arith.addf %13, %14 : vector<1x1x2xf32>
    %cst_12 = arith.constant 0.000000e+00 : f32
    %16 = vector.broadcast %cst_12 : f32 to vector<1x1x2xf32>
    %17 = arith.cmpf ogt, %15, %16 : vector<1x1x2xf32>
    %cst_13 = arith.constant 0.00999999977 : f32
    %18 = vector.broadcast %cst_13 : f32 to vector<1x1x2xf32>
    %19 = arith.mulf %18, %15 : vector<1x1x2xf32>
    %20 = arith.select %17, %15, %19 : vector<1x1x2xi1>, vector<1x1x2xf32>
    %21 = vector.shape_cast %7 : vector<4x2xf32> to vector<1x4x2xf32>
    %22 = vector.broadcast %20 : vector<1x1x2xf32> to vector<1x4x2xf32>
    %23 = arith.mulf %22, %21 : vector<1x4x2xf32>
    %cst_14 = arith.constant dense<0.000000e+00> : vector<1x4xf32>
    %24 = vector.multi_reduction <add>, %23, %cst_14 [2] : vector<1x4x2xf32> to vector<1x4xf32>
    %25 = vector.shape_cast %24 : vector<1x4xf32> to vector<1x4x1xf32>
    %26 = vector.shape_cast %8 : vector<4x1xf32> to vector<1x4x1xf32>
    %27 = arith.addf %25, %26 : vector<1x4x1xf32>
    %28 = arith.negf %27 : vector<1x4x1xf32>
    %29 = math.exp %28 : vector<1x4x1xf32>
    %cst_15 = arith.constant 1.000000e+00 : f32
    %30 = vector.broadcast %cst_15 : f32 to vector<1x4x1xf32>
    %31 = arith.addf %30, %29 : vector<1x4x1xf32>
    %32 = arith.divf %30, %31 : vector<1x4x1xf32>
    %c0_16 = arith.constant 0 : index
    %c0_17 = arith.constant 0 : index
    %c0_18 = arith.constant 0 : index
    %33 = vector.load %arg1[%c0_16, %c0_17, %c0_18] : memref<1x4x256xf32, #tpu.memory_space<vmem>>, vector<1x4x256xf32>
    %34 = vector.broadcast %32 : vector<1x4x1xf32> to vector<1x4x256xf32>
    %35 = arith.mulf %33, %34 : vector<1x4x256xf32>
    %c0_19 = arith.constant 0 : index
    %c0_20 = arith.constant 0 : index
    %c0_21 = arith.constant 0 : index
    %36 = vector.load %arg6[%c0_19, %c0_20, %c0_21] : memref<1x4x256xf32, #tpu.memory_space<vmem>>, vector<1x4x256xf32>
    tpu.vector_store %arg6[%c0_19, %c0_20, %c0_21], %35 {strides = array<i32>} : memref<1x4x256xf32, #tpu.memory_space<vmem>>, vector<1x4x256xf32>,
    return
  }
  func.func @transform_0(%arg0: i32) -> (i32, i32, i32) {
    %c0_i32 = arith.constant 0 : i32
    %c0_i32_0 = arith.constant 0 : i32
    %c0_i32_1 = arith.constant 0 : i32
    return %arg0, %c0_i32, %c0_i32_0 : i32, i32, i32
  }
  func.func @transform_1(%arg0: i32) -> (i32, i32) {
    %c0_i32 = arith.constant 0 : i32
    %c0_i32_0 = arith.constant 0 : i32
    %c0_i32_1 = arith.constant 0 : i32
    return %c0_i32, %c0_i32_0 : i32, i32
  }
  func.func @transform_2(%arg0: i32) -> (i32, i32) {
    %c0_i32 = arith.constant 0 : i32
    %c0_i32_0 = arith.constant 0 : i32
    %c0_i32_1 = arith.constant 0 : i32
    return %c0_i32, %c0_i32_0 : i32, i32
  }
  func.func @transform_3(%arg0: i32) -> (i32, i32) {
    %c0_i32 = arith.constant 0 : i32
    %c0_i32_0 = arith.constant 0 : i32
    %c0_i32_1 = arith.constant 0 : i32
    return %c0_i32, %c0_i32_0 : i32, i32
  }
  func.func @transform_4(%arg0: i32) -> (i32, i32) {
    %c0_i32 = arith.constant 0 : i32
    %c0_i32_0 = arith.constant 0 : i32
    %c0_i32_1 = arith.constant 0 : i32
    return %c0_i32, %c0_i32_0 : i32, i32
  }
  func.func @transform_5(%arg0: i32) -> (i32, i32, i32) {
    %c0_i32 = arith.constant 0 : i32
    %c0_i32_0 = arith.constant 0 : i32
    %c0_i32_1 = arith.constant 0 : i32
    return %arg0, %c0_i32, %c0_i32_0 : i32, i32, i32
  }
}

</mosaic_0001>

<bundles_post_ra>
// kernel: tpu_custom_call.1
= control target key start
LH: loop header
LB: loop body
LE: loop exit
PB: predicated region body
PF: predicated region fallthrough
CT: control target
= control target key end

     0   :  { %10 = vsyncpa [#allocation3], 0  ;;  %s613_s0 = inlined_call_operand.vmem [shape: f32[2,4,256], index: 0, kind: input, shape index: {}]   ;;  %s614_s1 = inlined_call_operand.vmem [shape: f32[4,2], index: 1, kind: input, shape index: {}]   ;;  %s615_s2 = inlined_call_operand.vmem [shape: f32[1,2], index: 2, kind: input, shape index: {}]   ;;  %s616_s3 = inlined_call_operand.vmem [shape: f32[4,2], index: 3, kind: input, shape index: {}]   ;;  %s617_s4 = inlined_call_operand.vmem [shape: f32[4,1], index: 4, kind: input, shape index: {}]   ;;  %s618_s5 = inlined_call_operand.hbm [shape: f32[2,4,256], index: 5, kind: output, shape index: {}]  }
   0x1   :  { %12 = vsyncpa [#allocation3 + $0x1], 0  ;;  %s512_s18 = smov 0   ;;  %s514_s19 = smov 0  }
   0x2   :  { %s516_s20 = smov 0   ;;  %s518_s21 = smov 0  }
   0x3 LB: > { %s533_s22 = sadd.s32 4294967295, %s477_s21   ;;  %s354_s23 = sadd.s32 4294967294, %s477_s21   ;;  %s477_s21 = sphi %s518_s21, %s624_s21   ;;  %s473_s20 = sphi %s516_s20, %s623_s20   ;;  %s469_s19 = sphi %s514_s19, %s622_s19   ;;  %s465_s18 = sphi %s512_s18, %s621_s18  }
   0x4   : > { %s537_s24 = sadd.s32 1, %s477_s21   ;;  %s135_s25 = sadd.s32 1, %s473_s20 }
   0x5   : > { %s132_s26 = ssub.s32 %s477_s21, %s537_s24  ;;  %p145_p0 = scmp.ne.s32.totalorder %s473_s20, %s469_s19 }
   0x6   : > { %p133_p1 = scmp.eq.s32.totalorder %s132_s26, 0  ;;  %p146_p2 = scmp.eq.s32.totalorder %s533_s22, 1 }
   0x7   : > { %p151_p3 = scmp.ne.s32.totalorder %s469_s19, %s465_s18  ;;  %p152_p4 = scmp.eq.s32.totalorder %s354_s23, 1 }
   0x8   : > { %s548_s27 = scalar_select %p133_p1, %s473_s20, %s135_s25  }
   0x9   : > { %p550_p5 = por %p146_p2, %p145_p0  ;;  %p554_p6 = por %p152_p4, %p151_p3 }
   0xa   : > { %p357_p7 = scmp.ge.s32.totalorder %s477_s21, 1  ;;  %p190_p8 = scmp.lt.s32.totalorder %s477_s21, 3 }
   0xc   : > { %p191_p9 = pnand %p357_p7, %p190_p8 }
   0xd   : > { %p218_p10 = scmp.lt.s32.totalorder (!%p191_p9), %s533_s22, 1  ;;  %s215_s23 = sand.u32 (!%p191_p9), 1, %s469_s19  }
   0xe   : > { %194 = sbr.rel (%p191_p9) target bundleno = 507 (0x1fb), region = 40  ;;  %s358_s25 = sshll.u32 (!%p191_p9), %s215_s23, 3 }
   0xf   : > { %s368_s26 = sshll.u32 (!%p191_p9), %s533_s22, 7  ;;  %s281_s10 = scalar_lea.sflag (!%p191_p9), [#allocation3], %s215_s23 }
  0x10   : > { %s481_s12 = smov (!%p191_p9), [#allocation2]  }
  0x11   : > { %s421_s13 = sshll.u32 (!%p191_p9), %s481_s12, 4  ;;  %s422_s13 = int_to_ptr.vmem [resolvable:$false] %s421_s13 }
  0x13   : > { %s219_s30 = scalar_select %p218_p10, %s533_s22, 1  ;;  %vm227_vm0 = vcmask 1043456   ;;  %v234_v5 = vld [vmem:[%s614_s1] sm:$0xf]  ;;  %vm239_vm1 = vcmask 11264   ;;  %v251_v13 = vlaneseq  ;;  %v479_v27 = vmov 0  }
  0x14   : > { %v235_v16 = vld [vmem:[%s615_s2] sm:$0x1]  ;;  %410 = vset.pattern.permute.xlu1 %v479_v27  ;;  %411 = vset.pattern.permute.xlu0 %v479_v27  ;;  %v480_v35 = vmov 839922192   ;;  %s423_s22 = scalar_lea.vmem %s422_s13, 256 }
  0x15   : > { %s367_s6 = sshll.u32 %s219_s30, 3  ;;  %v252_v17 = vshrl.u32 %v251_v13, 7  ;;  %v236_v22 = vld [vmem:[%s616_s3] sm:$0xf]  ;;  %v271_v36 = vunpack.c.l.s4 %v480_v35  ;;  %s217_s30 = scalar_lea.vmem [#allocation2], %s358_s25 }
  0x16   : > { %s222_s9 = scalar_lea.vmem %s613_s0, %s367_s6  ;;  %v237_v28 = vld [vmem:[%s617_s4] sm:$0xf]  ;;  %s295_s6 = sshll.u32 %s217_s30, 4  ;;  %s296_s6 = int_to_ptr.vmem [resolvable:$true] %s295_s6 }
  0x17   : > { %v223_v0 = vld [vmem:[%s222_s9] sm:$0xff]  ;;  %v253_v20 = vsub.s32 0, %v252_v17  ;;  %v272_v37 = vunpack.c.0.s8 %v271_v36  ;;  %s293_s9 = scalar_lea.hbm %s618_s5, %s368_s26  ;;  %s417_s11 = scalar_lea.vmem %s296_s6, 128 }
  0x18   : > { %v225_v1 = vcombine.high %v223_v0, %v223_v0  ;;  %v228_v2 = vsel %vm227_vm0, %v223_v0, 0.0  ;;  %p418_p11 = scmp.ne.s32.totalorder %s296_s6, %s417_s11  ;;  %p424_p0 = scmp.lt.s32.totalorder %s296_s6, %s422_s13 }
  0x19   : > { %v275_v38 = vsub.s32 %v272_v37, %v252_v17  ;;  %p425_p1 = scmp.lt.s32.totalorder %s423_s22, %s417_s11 }
  0x1a   : > { %v229_v3 = vsel %vm227_vm0, %v225_v1, 0.0  ;;  %p419_p12 = pnand %p418_p11, %p550_p5 }
  0x1b   : > { %v230_v4 = vadd.f32 %v229_v3, %v228_v2  ;;  %p426_p2 = por %p425_p1, %p424_p0 }
  0x1c   : > { %p420_p13 = pneg %p419_p12 }
  0x1d   : > { %231 = vadd.xlane.f32.xlu0 %v230_v4 }
  0x1e   : > { %p427_p3 = pnand %p426_p2, %p420_p13 }
  0xa6   : > { %v232_v6 = vpop.xlane.xlu0 %231 }
  0xa7   : > { %v233_v7 = vmul.f32 0.00390625, %v232_v6 }
  0xa9   : > { %v238_v8 = vmul.f32 %v234_v5, %v233_v7 }
  0xab   : > { %v240_v9 = vsel %vm239_vm1, %v238_v8, 0.0 }
  0xac   : > { %v241_v10 = vrot.slane %v240_v9, 4 }
  0xae   : > { %v242_v11 = vadd.f32 %v241_v10, %v240_v9 }
  0xb0   : > { %v243_v12 = vrot.slane %v242_v11, 2 }
  0xb2   : > { %v244_v14 = vadd.f32 %v243_v12, %v242_v11 }
  0xb4   : > { %v245_v15 = vrot.slane %v244_v14, 1 }
  0xb6   : > { %v246_v18 = vadd.f32 %v245_v15, %v244_v14 }
  0xb8   : > { %v247_v19 = vadd.f32 %v246_v18, %v235_v16 }
  0xba   : > { %vm248_vm2 = vcmp.gt.f32.partialorder %v247_v19, 0.0  ;;  %v249_v21 = vmul.f32 0.01, %v247_v19 }
  0xbc   : > { %v250_v23 = vsel %vm248_vm2, %v247_v19, %v249_v21 }
  0xbd   : > { %v254_v24 = vrot.slane %v250_v23, %v253_v20 }
  0xbf   : > { %v255_v25 = vmul.f32 %v254_v24, %v236_v22 }
  0xc1   : > { %v256_v26 = vsel %vm239_vm1, %v255_v25, 0.0 }
  0xc2   : > { %257 = vadd.xlane.f32.xlu0 %v256_v26 }
 0x14b   : > { %v258_v29 = vpop.xlane.xlu0 %257 }
 0x14c   : > { %v259_v30 = vadd.f32 %v258_v29, %v237_v28 }
 0x14e   : > { %v361_v31 = vmul.f32 -1.442695, %v259_v30 }
 0x150   : > { %413 = vpow2.f32 %v361_v31 }
 0x15d   : > { %v414_v32 = vpop.eup %413 }
 0x15e   : > { %v263_v33 = vadd.f32 1.0, %v414_v32 }
 0x160   : > { %415 = vrcp.f32 %v263_v33 }
 0x16d   : > { %v416_v34 = vpop.eup %415 }
 0x16e   : > { %268 = vperm.xlu1 %410, %v416_v34  }
 0x1e9   : > { %v269_v39 = vpop.permute.xlu1 %268 }
 0x1ea   : > { %v276_v40 = vrot.slane %v269_v39, %v275_v38 }
 0x1ec   : > { %v278_v41 = vmul.f32 %v276_v40, %v223_v0 }
 0x1ee   : > { %279 = vst [vmem:[%s217_s30] sm:$0xff] %v278_v41 }
 0x1ef   : > { %430 = shalt.err (!%p427_p3)
}
 0x1f0   : > { %s431_s14 = scalar_lea.hbm %s293_s9, 128  ;;  %s435_s17 = scalar_lea.hbm %s618_s5, 256 }
 0x1f1   : > { %p432_p4 = scmp.ne.s32.totalorder %s293_s9, %s431_s14  ;;  %p436_p9 = scmp.lt.s32.totalorder %s293_s9, %s618_s5 }
 0x1f2   : > { %p437_p10 = scmp.lt.s32.totalorder %s435_s17, %s431_s14 }
 0x1f3   : > { %p433_p7 = pnand %p432_p4, %p550_p5 }
 0x1f4   : > { %p438_p11 = por %p437_p10, %p436_p9 }
 0x1f5   : > { %p434_p8 = pneg %p433_p7 }
 0x1f7   : > { %p439_p12 = pnand %p438_p11, %p434_p8 }
 0x1f9   : > { %442 = shalt.err (!%p439_p12)
}
 0x1fa   : > { %369 = dma.vmem_to_hbm [thread:$0]  (%p550_p5), %s296_s6, 128, %s293_s9, %s281_s10  }
 0x1fb PF: > { %p375_p13 = scmp.ge.s32.totalorder %s477_s21, 2  ;;  %s307_s26 = sand.u32 1, %s465_s18  }
 0x1fc   : > { %s308_s30 = scalar_lea.sflag [#allocation3], %s307_s26 }
 0x1fd   : > { %p372_p0 = pnand %p375_p13, %p554_p6 }
 0x1ff   : > { %p373_p1 = pneg %p372_p0 }
 0x201   : > { %460 = dma.done.wait (%p373_p1), %s308_s30, 128  }
 0x202   : > { %462 = vsyncadd (%p373_p1), %s308_s30, 4294967168  ;;  %p15_p2 = scmp.ge.s32.totalorder %s537_s24, 4   ;;  %s621_s18 = smov %s469_s19 }
 0x203   : > { %s622_s19 = smov %s473_s20  ;;  %s623_s20 = smov %s548_s27 }
 0x204   : > { %s624_s21 = smov %s537_s24  ;;  %17 = sbr.rel (!%p15_p2) target bundleno = 3 (0x3), region = 75 }
 0x209   :  { %313 = vsyncpa [#allocation3], 1 }
 0x20a   :  { %315 = vsyncpa [#allocation3 + $0x1], 1 }

</bundles_post_ra>
